<compile_context>
chip_gen: v6e
topology: v6e:2x2x1
jax: 0.10.0
libtpu: 0.0.40
codegen_flags: <defaults>
</compile_context>

<pallas_src>
import jax
import jax.numpy as jnp
from jax.experimental import pallas as pl
from jax.experimental.pallas import tpu as pltpu


_BIG = 3.0e38  # fill for padded codebook slots / running-min init (never selected)


def _round_up(x, m):
    return ((x + m - 1) // m) * m


def _vq_kernel_resident(z_ref, wt_ref, wsq_ref, idx_ref):
    """Codebook fully VMEM-resident: single argmin over all K per row tile."""
    # argmin_j ||z - w_j||^2  ==  argmin_j ( 0.5*||w_j||^2 - z . w_j )
    cross = jnp.dot(z_ref[...], wt_ref[...],
                    preferred_element_type=jnp.float32)        # MXU (tn, K_pad)
    dist = wsq_ref[...] - cross                                # (tn, K_pad)
    idx_ref[...] = jnp.argmin(dist, axis=-1, keepdims=True).astype(jnp.int32)


def _vq_kernel_ktiled(z_ref, wt_ref, wsq_ref, idx_ref, best_d_ref, best_i_ref):
    """Large-codebook path: K tiled on the innermost ('arbitrary') grid axis.

    NOTE: the running-min scratch and the init/finalize gates assume the K axis
    is the innermost, sequentially iterated, 'arbitrary' grid axis.  Do not
    reorder the grid or mark it parallel.
    """
    k = pl.program_id(1)
    tk = wt_ref.shape[1]  # static K-tile size

    @pl.when(k == 0)
    def _init():
        best_d_ref[...] = jnp.full(best_d_ref.shape, _BIG, dtype=jnp.float32)
        best_i_ref[...] = jnp.zeros(best_i_ref.shape, dtype=jnp.int32)

    cross = jnp.dot(z_ref[...], wt_ref[...],
                    preferred_element_type=jnp.float32)        # MXU (tn, tk)
    dist = wsq_ref[...] - cross                                # (tn, tk)

    local_min = jnp.min(dist, axis=-1, keepdims=True)                      # (tn, 1)
    local_arg = (jnp.argmin(dist, axis=-1, keepdims=True).astype(jnp.int32)
                 + k * tk)                                                  # (tn, 1)

    better = local_min < best_d_ref[...]       # strict < keeps earlier tile on ties
    best_i_ref[...] = jnp.where(better, local_arg, best_i_ref[...])
    best_d_ref[...] = jnp.where(better, local_min, best_d_ref[...])

    @pl.when(k == pl.num_programs(1) - 1)
    def _finalize():
        idx_ref[...] = best_i_ref[...]


def vq_embedding_forward(z, codebook, *, tn=512, tk=1024,
                         resident_codebook_bytes=16 * 1024 * 1024,
                         vmem_limit_bytes=32 * 1024 * 1024,
                         matmul_dtype=None):
    """z: (N, D) f32; codebook: (K, D) f32 -> (z_q (N, D) f32, indices (N,) int32).

    matmul_dtype: optional (e.g. jnp.bfloat16) dtype for the MXU cross matmul on
    v6e/v7x; default keeps f32 for exact argmin parity on near-ties.
    """
    N, D = z.shape
    K, D2 = codebook.shape
    assert D == D2

    z = z.astype(jnp.float32)
    codebook = codebook.astype(jnp.float32)

    mm_dtype = jnp.float32 if matmul_dtype is None else matmul_dtype
    mm_bytes = jnp.dtype(mm_dtype).itemsize

    # ---------- tile / padding geometry (D is NOT padded) ----------
    K_pad = _round_up(K, 128)
    resident = (K_pad * D * mm_bytes + K_pad * 4) <= resident_codebook_bytes

    # Row tile: multiple of 128, never larger than the data, and give the
    # "parallel" rows axis at least two tiles when N allows it (v7x: 2 TCs).
    tn = _round_up(min(max(tn, 128), _round_up(N, 128)), 128)
    if N >= 256:
        tn = min(tn, _round_up(-(-N // 2), 128))
    if resident:
        # Bound the (tn, K_pad) f32 distance intermediate to ~4 MiB.
        while tn > 128 and tn * K_pad * 4 > (4 << 20):
            tn = max(128, _round_up(tn // 2, 128))
    N_pad = _round_up(N, tn)

    if resident:
        tk = K_pad
    else:
        tk = min(_round_up(max(tk, 128), 128), K_pad)
        K_pad = _round_up(K, tk)  # ensure K_pad % tk == 0

    # ---------- one-time wrapper-side precompute (hoisted out of the kernel) ----------
    cb_p = jnp.pad(codebook, ((0, K_pad - K), (0, 0)))                # (K_pad, D) f32
    wT = cb_p.T.astype(mm_dtype)                                      # (D, K_pad)
    half_wsq = 0.5 * jnp.sum(cb_p * cb_p, axis=1)                     # (K_pad,) f32
    half_wsq = jnp.where(jnp.arange(K_pad) < K, half_wsq, _BIG)[None, :]  # (1, K_pad)
    half_wsq = half_wsq.astype(jnp.float32)

    z_p = jnp.pad(z, ((0, N_pad - N), (0, 0))).astype(mm_dtype)       # (N_pad, D)

    # ---------- pallas_call ----------
    if resident:
        grid = (N_pad // tn,)
        idx_p = pl.pallas_call(
            _vq_kernel_resident,
            out_shape=jax.ShapeDtypeStruct((N_pad, 1), jnp.int32),
            grid_spec=pltpu.PrefetchScalarGridSpec(
                num_scalar_prefetch=0,
                grid=grid,
                in_specs=[
                    pl.BlockSpec((tn, D), lambda i: (i, 0)),       # z row tile
                    pl.BlockSpec((D, K_pad), lambda i: (0, 0)),    # codebook^T (resident)
                    pl.BlockSpec((1, K_pad), lambda i: (0, 0)),    # 0.5*||w||^2 (resident)
                ],
                out_specs=pl.BlockSpec((tn, 1), lambda i: (i, 0)), # indices column
            ),
            compiler_params=pltpu.CompilerParams(
                dimension_semantics=("parallel",),
                vmem_limit_bytes=vmem_limit_bytes,
            ),
        )(z_p, wT, half_wsq)
    else:
        grid = (N_pad // tn, K_pad // tk)
        idx_p = pl.pallas_call(
            _vq_kernel_ktiled,
            out_shape=jax.ShapeDtypeStruct((N_pad, 1), jnp.int32),
            grid_spec=pltpu.PrefetchScalarGridSpec(
                num_scalar_prefetch=0,
                grid=grid,
                in_specs=[
                    pl.BlockSpec((tn, D), lambda i, k: (i, 0)),    # z row tile (resident over k)
                    pl.BlockSpec((D, tk), lambda i, k: (0, k)),    # codebook^T K-tile
                    pl.BlockSpec((1, tk), lambda i, k: (0, k)),    # 0.5*||w||^2 K-tile
                ],
                out_specs=pl.BlockSpec((tn, 1), lambda i, k: (i, 0)),
                scratch_shapes=[
                    pltpu.VMEM((tn, 1), jnp.float32),   # running min distance
                    pltpu.VMEM((tn, 1), jnp.int32),     # running argmin index
                ],
            ),
            compiler_params=pltpu.CompilerParams(
                # K axis must stay innermost + "arbitrary" (running-min scratch).
                dimension_semantics=("parallel", "arbitrary"),
                vmem_limit_bytes=vmem_limit_bytes,
            ),
        )(z_p, wT, half_wsq)

    indices = idx_p[:N, 0]
    # Forward value of z_q + (z - z_q).detach() is exactly z -> return z; no
    # kernel output / HBM copy needed.
    # TODO(synk): the straight-through-estimator / embedding gradients are
    # autograd-only; wrap with jax.custom_vjp if a backward pass is required.
    z_q = z
    return z_q, indices


if __name__ == "__main__":
    # Module hyperparameters (small, deterministic).
    num_embeddings = 128   # K
    embedding_dim = 32     # D
    N = 256                # number of input vectors

    key = jax.random.PRNGKey(0)
    k_w, k_z = jax.random.split(key)

    # nn.Embedding weight init: uniform(-1/K, 1/K), shape (K, D)
    codebook = jax.random.uniform(
        k_w, (num_embeddings, embedding_dim), dtype=jnp.float32,
        minval=-1.0 / num_embeddings, maxval=1.0 / num_embeddings)

    # Input z: (N, D)
    z = jax.random.normal(k_z, (N, embedding_dim), dtype=jnp.float32)

    # Pure-JAX reference (same math as the PyTorch forward).
    dist_ref = (jnp.sum(z ** 2, axis=1, keepdims=True)
                + jnp.sum(codebook ** 2, axis=1)
                - 2.0 * z @ codebook.T)
    idx_ref = jnp.argmin(dist_ref, axis=-1).astype(jnp.int32)
    zq_lookup_ref = codebook[idx_ref]
    zq_ref = zq_lookup_ref + (z - zq_lookup_ref)
    min_d = dist_ref.min(axis=-1)

    def check(z_q, indices):
        assert z_q.shape == (N, embedding_dim) and indices.shape == (N,)
        assert bool(jnp.all((indices >= 0) & (indices < num_embeddings))), "index out of range"
        # Chosen code must achieve the per-row minimum distance (robust to f32
        # rounding / tie order; torch.min does not pin down tie behavior either).
        chosen_d = jnp.take_along_axis(dist_ref, indices[:, None], axis=-1)[:, 0]
        assert bool(jnp.all(chosen_d <= min_d + 1e-4)), "index/distance mismatch"
        assert bool(jnp.allclose(z_q, zq_ref, atol=1e-5, rtol=1e-5)), "z_q mismatch"

    # Fast path: codebook resident in VMEM, single grid axis over rows.
    z_q, indices = vq_embedding_forward(z, codebook)
    jax.block_until_ready((z_q, indices))
    check(z_q, indices)

    # Fallback path: force K-tiling (exercises the running-min kernel).
    z_q2, indices2 = vq_embedding_forward(z, codebook, resident_codebook_bytes=0)
    jax.block_until_ready((z_q2, indices2))
    check(z_q2, indices2)

    print("KERNEL_OK")
</pallas_src>

<mosaic_0001>
module attributes {stable_mosaic.version = 11 : i64} {
  func.func @_vq_kernel_resident(%arg0: i32, %arg1: memref<128x32xf32, #tpu.memory_space<vmem>>, %arg2: memref<32x128xf32, #tpu.memory_space<vmem>>, %arg3: memref<1x128xf32, #tpu.memory_space<vmem>>, %arg4: memref<128x1xi32, #tpu.memory_space<vmem>>) attributes {dimension_semantics = [#tpu.dimension_semantics<parallel>], iteration_bounds = array<i64: 2>, scalar_prefetch = 0 : i64, scratch_operands = 0 : i64, tpu.core_type = #tpu.core_type<tc>, window_params = [{transform_indices = @transform_0, window_bounds = array<i64: 128, 32>}, {pipeline_mode = #tpu.pipeline_mode<synchronous>, transform_indices = @transform_1, window_bounds = array<i64: 32, 128>}, {pipeline_mode = #tpu.pipeline_mode<synchronous>, transform_indices = @transform_2, window_bounds = array<i64: 1, 128>}, {transform_indices = @transform_3, window_bounds = array<i64: 128, 1>}]} {
    %c0 = arith.constant 0 : index
    %c0_0 = arith.constant 0 : index
    %0 = vector.load %arg1[%c0, %c0_0] : memref<128x32xf32, #tpu.memory_space<vmem>>, vector<128x32xf32>
    %c0_1 = arith.constant 0 : index
    %c0_2 = arith.constant 0 : index
    %1 = vector.load %arg2[%c0_1, %c0_2] : memref<32x128xf32, #tpu.memory_space<vmem>>, vector<32x128xf32>
    %cst = arith.constant dense<0.000000e+00> : vector<128x128xf32>
    %2 = tpu.matmul %0, %1, %cst {dimension_numbers = #tpu.dot_dimension_numbers<[1], [0], [0], [1], [0, 0, 1, 1], [], []>} : vector<128x32xf32>, vector<32x128xf32>, vector<128x128xf32> -> vector<128x128xf32>
    %c0_3 = arith.constant 0 : index
    %c0_4 = arith.constant 0 : index
    %3 = vector.load %arg3[%c0_3, %c0_4] : memref<1x128xf32, #tpu.memory_space<vmem>>, vector<1x128xf32>
    %4 = vector.broadcast %3 : vector<1x128xf32> to vector<128x128xf32>
    %5 = arith.subf %4, %2 : vector<128x128xf32>
    %6 = tpu.reduce_index %5 {axis = 1 : i32, kind = #tpu.reduction_kind<arg_min>} : vector<128x128xf32> -> vector<128xi32>
    %7 = vector.shape_cast %6 : vector<128xi32> to vector<128x1xi32>
    %c0_5 = arith.constant 0 : index
    %c0_6 = arith.constant 0 : index
    %8 = vector.load %arg4[%c0_5, %c0_6] : memref<128x1xi32, #tpu.memory_space<vmem>>, vector<128x1xi32>
    tpu.vector_store %arg4[%c0_5, %c0_6], %7 {strides = array<i32>} : memref<128x1xi32, #tpu.memory_space<vmem>>, vector<128x1xi32>,
    return
  }
  func.func @transform_0(%arg0: i32) -> (i32, i32) {
    %c0_i32 = arith.constant 0 : i32
    %c0_i32_0 = arith.constant 0 : i32
    return %arg0, %c0_i32 : i32, i32
  }
  func.func @transform_1(%arg0: i32) -> (i32, i32) {
    %c0_i32 = arith.constant 0 : i32
    %c0_i32_0 = arith.constant 0 : i32
    %c0_i32_1 = arith.constant 0 : i32
    return %c0_i32, %c0_i32_0 : i32, i32
  }
  func.func @transform_2(%arg0: i32) -> (i32, i32) {
    %c0_i32 = arith.constant 0 : i32
    %c0_i32_0 = arith.constant 0 : i32
    %c0_i32_1 = arith.constant 0 : i32
    return %c0_i32, %c0_i32_0 : i32, i32
  }
  func.func @transform_3(%arg0: i32) -> (i32, i32) {
    %c0_i32 = arith.constant 0 : i32
    %c0_i32_0 = arith.constant 0 : i32
    return %arg0, %c0_i32 : i32, i32
  }
}

</mosaic_0001>

<bundles_post_ra>
// kernel: tpu_custom_call.1
= control target key start
LH: loop header
LB: loop body
LE: loop exit
PB: predicated region body
PF: predicated region fallthrough
CT: control target
= control target key end

     0   :  { %s640_s12 = smov 0   ;;  %s747_s0 = inlined_call_operand.vmem [shape: f32[256,32], index: 0, kind: input, shape index: {}]   ;;  %s748_s1 = inlined_call_operand.vmem [shape: f32[32,128], index: 1, kind: input, shape index: {}]   ;;  %s749_s2 = inlined_call_operand.vmem [shape: f32[1,128], index: 2, kind: input, shape index: {}]   ;;  %s750_s3 = inlined_call_operand.vmem [shape: s32[256,1], index: 3, kind: output, shape index: {}]  }
   0x1 LB: > { %s516_s13 = sadd.s32 4294967295, %s618_s12   ;;  %p520_p0 = scmp.ge.s32.totalorder %s618_s12, 1  ;;  %s618_s12 = sphi %s640_s12, %s13_s12  }
   0x2   : > { %p138_p1 = scmp.lt.s32.totalorder %s618_s12, 3 }
   0x4   : > { %p139_p2 = pnand %p520_p0, %p138_p1 }
   0x5   : > { %s521_s18 = sshll.u32 (!%p139_p2), %s516_s13, 4 }
   0x6   : > { %142 = sbr.rel (%p139_p2) target bundleno = 383 (0x17f), region = 32  ;;  %p163_p3 = scmp.lt.s32.totalorder (!%p139_p2), %s521_s18, 31 }
   0xb   : > { %v193_v0 = vld [vmem:[%s748_s1 + $0x18] sm:$0xff]  ;;  %v192_v1 = vld [vmem:[%s748_s1 + $0x10] sm:$0xff]  ;;  %v191_v2 = vld [vmem:[%s748_s1 + $0x8] sm:$0xff]  ;;  %s752_s18 = smov (!%p163_p3, %s521_s18), 31  ;;  %vm194_vm0 = vcmask 261120   ;;  %vm443_vm1 = vcmask 7168  }
   0xc   : > { %564 = vmatprep.subr.mxu0 %v193_v0  ;;  %596 = vmatprep.subr.mxu1 %v193_v0  ;;  %v190_v3 = vld [vmem:[%s748_s1] sm:$0xff]  ;;  %s522_s23 = sshll.u32 %s752_s18, 3 }
   0xd   : > { %565 = vmatpush3.msra.mxu0 %v193_v0  ;;  %600 = vmatpush3.msra.mxu1 %v193_v0  ;;  %s668_s26 = scalar_lea.vmem %s747_s0, %s522_s23  ;;  %v541_v20 = vld [vmem:[%s749_s2] ss:$0 sm:$0xff]  ;;  %s710_s4 = scalar_lea.vmem %s750_s3, %s522_s23 }
   0xe   : > { %566 = vmatprep.subr.mxu0 %v192_v1  ;;  %597 = vmatprep.subr.mxu1 %v192_v1  ;;  %v174_v4 = vld [vmem:[%s668_s26] sm:$0xff]  ;;  %v175_v6 = vld [vmem:[%s668_s26 + $0x8] sm:$0xff]  ;;  %v176_v8 = vld [vmem:[%s668_s26 + $0x10] sm:$0xff] }
   0xf   : > { %567 = vmatpush3.msra.mxu0 %v192_v1  ;;  %601 = vmatpush3.msra.mxu1 %v192_v1  ;;  %v182_v5 = vld [vmem:[%s668_s26 + $0x40] sm:$0xff]  ;;  %v183_v7 = vld [vmem:[%s668_s26 + $0x48] sm:$0xff]  ;;  %v184_v9 = vld [vmem:[%s668_s26 + $0x50] sm:$0xff] }
  0x10   : > { %568 = vmatprep.subr.mxu0 %v191_v2  ;;  %598 = vmatprep.subr.mxu1 %v191_v2  ;;  %v177_v10 = vld [vmem:[%s668_s26 + $0x18] sm:$0xff]  ;;  %v178_v12 = vld [vmem:[%s668_s26 + $0x20] sm:$0xff]  ;;  %v179_v14 = vld [vmem:[%s668_s26 + $0x28] sm:$0xff] }
  0x11   : > { %569 = vmatpush3.msra.mxu0 %v191_v2  ;;  %602 = vmatpush3.msra.mxu1 %v191_v2  ;;  %v185_v11 = vld [vmem:[%s668_s26 + $0x58] sm:$0xff]  ;;  %v186_v13 = vld [vmem:[%s668_s26 + $0x60] sm:$0xff]  ;;  %v187_v15 = vld [vmem:[%s668_s26 + $0x68] sm:$0xff] }
  0x12   : > { %570 = vmatprep.subr.mxu0 %v190_v3  ;;  %599 = vmatprep.subr.mxu1 %v190_v3  ;;  %v180_v16 = vld [vmem:[%s668_s26 + $0x30] sm:$0xff]  ;;  %v181_v18 = vld [vmem:[%s668_s26 + $0x38] sm:$0xff] }
  0x13   : > { %571 = vmatpush3.msra.mxu0 %v190_v3  ;;  %603 = vmatpush3.msra.mxu1 %v190_v3  ;;  %v188_v17 = vld [vmem:[%s668_s26 + $0x70] sm:$0xff]  ;;  %v189_v19 = vld [vmem:[%s668_s26 + $0x78] sm:$0xff] }
  0x14   : > { %572 = vmatprep.mubr.msk.f32.mxu0 %vm194_vm0, %v174_v4  ;;  %584 = vmatprep.mubr.msk.f32.mxu1 %vm194_vm0, %v182_v5 }
  0x15   : > { %573 = vmatmul.mubr.msk.f32.vlgmr.msra.gmra.mxu0 %vm194_vm0, %v175_v6  ;;  %585 = vmatmul.mubr.msk.f32.vlgmr.msra.gmra.mxu1 %vm194_vm0, %v183_v7 }
  0x16   : > { %575 = vmatprep.mubr.msk.f32.mxu0 %vm194_vm0, %v176_v8  ;;  %587 = vmatprep.mubr.msk.f32.mxu1 %vm194_vm0, %v184_v9 }
  0x19   : > { %576 = vmatmul.mubr.msk.f32.gmra.mxu0 %vm194_vm0, %v177_v10  ;;  %588 = vmatmul.mubr.msk.f32.gmra.mxu1 %vm194_vm0, %v185_v11 }
  0x1a   : > { %578 = vmatprep.mubr.msk.f32.mxu0 %vm194_vm0, %v178_v12  ;;  %590 = vmatprep.mubr.msk.f32.mxu1 %vm194_vm0, %v186_v13 }
  0x1d   : > { %579 = vmatmul.mubr.msk.f32.gmra.mxu0 %vm194_vm0, %v179_v14  ;;  %591 = vmatmul.mubr.msk.f32.gmra.mxu1 %vm194_vm0, %v187_v15 }
  0x1e   : > { %581 = vmatprep.mubr.msk.f32.mxu0 %vm194_vm0, %v180_v16  ;;  %593 = vmatprep.mubr.msk.f32.mxu1 %vm194_vm0, %v188_v17 }
  0x21   : > { %582 = vmatmul.mubr.msk.f32.gmra.mxu0 %vm194_vm0, %v181_v18  ;;  %594 = vmatmul.mubr.msk.f32.gmra.mxu1 %vm194_vm0, %v189_v19 }
  0xd5   : > { %v574_v21 = vpop.f32.mrf.mxu0  ;;  %v586_v22 = vpop.f32.mrf.mxu1 }
  0xd6   : > { %v404_v23 = vsub.f32 %v541_v20, %v586_v22  ;;  %v396_v24 = vsub.f32 %v541_v20, %v574_v21 }
  0xd7   : > { %v309_v25 = vpop.f32.mrf.mxu0  ;;  %v349_v26 = vpop.f32.mrf.mxu1 }
  0xd8   : > { %429 = vmin.index.xlane.f32.xlu1 %v404_v23  ;;  %413 = vmin.index.xlane.f32.xlu0 %v396_v24  ;;  %v395_v28 = vsub.f32 %v541_v20, %v309_v25  ;;  %v403_v33 = vsub.f32 %v541_v20, %v349_v26 }
  0xd9   : > { %v577_v27 = vpop.f32.mrf.mxu0  ;;  %v589_v30 = vpop.f32.mrf.mxu1 }
  0xda   : > { %v398_v29 = vsub.f32 %v541_v20, %v577_v27  ;;  %v406_v31 = vsub.f32 %v541_v20, %v589_v30 }
  0xdb   : > { %v319_v32 = vpop.f32.mrf.mxu0  ;;  %v359_v34 = vpop.f32.mrf.mxu1 }
  0xdc   : > { %411 = vmin.index.xlane.f32.xlu0 %v395_v28  ;;  %417 = vmin.index.xlane.f32.xlu1 %v398_v29  ;;  %v397_v36 = vsub.f32 %v541_v20, %v319_v32  ;;  %v405_v37 = vsub.f32 %v541_v20, %v359_v34 }
  0xdd   : > { %v580_v35 = vpop.f32.mrf.mxu0  ;;  %v592_v39 = vpop.f32.mrf.mxu1 }
  0xde   : > { %v400_v40 = vsub.f32 %v541_v20, %v580_v35  ;;  %v408_v44 = vsub.f32 %v541_v20, %v592_v39 }
  0xdf   : > { %v329_v38 = vpop.f32.mrf.mxu0  ;;  %v369_v42 = vpop.f32.mrf.mxu1 }
  0xe0   : > { %427 = vmin.index.xlane.f32.xlu0 %v403_v33  ;;  %433 = vmin.index.xlane.f32.xlu1 %v406_v31  ;;  %v399_v41 = vsub.f32 %v541_v20, %v329_v38  ;;  %v407_v45 = vsub.f32 %v541_v20, %v369_v42 }
  0xe1   : > { %v583_v43 = vpop.f32.mrf.mxu0  ;;  %v595_v47 = vpop.f32.mrf.mxu1 }
  0xe2   : > { %v402_v48 = vsub.f32 %v541_v20, %v583_v43  ;;  %v410_v51 = vsub.f32 %v541_v20, %v595_v47 }
  0xe3   : > { %v339_v46 = vpop.f32.mrf.mxu0  ;;  %v379_v50 = vpop.f32.mrf.mxu1 }
  0xe4   : > { %431 = vmin.index.xlane.f32.xlu0 %v405_v37  ;;  %415 = vmin.index.xlane.f32.xlu1 %v397_v36  ;;  %v401_v49 = vsub.f32 %v541_v20, %v339_v46  ;;  %v409_v52 = vsub.f32 %v541_v20, %v379_v50 }
  0xe8   : > { %421 = vmin.index.xlane.f32.xlu1 %v400_v40  ;;  %419 = vmin.index.xlane.f32.xlu0 %v399_v41 }
  0xec   : > { %437 = vmin.index.xlane.f32.xlu1 %v408_v44  ;;  %435 = vmin.index.xlane.f32.xlu0 %v407_v45 }
  0xf0   : > { %425 = vmin.index.xlane.f32.xlu1 %v402_v48  ;;  %423 = vmin.index.xlane.f32.xlu0 %v401_v49 }
  0xf4   : > { %441 = vmin.index.xlane.f32.xlu1 %v410_v51  ;;  %439 = vmin.index.xlane.f32.xlu0 %v409_v52 }
 0x161   : > { %v430_v53 = vpop.xlane.xlu1 %429  ;;  %v414_v54 = vpop.xlane.xlu0 %413 }
 0x162   : > { %453 = vst.msk [vmem:[%s710_s4 + $0x48] sm:$0xff] %vm443_vm1, %v430_v53  ;;  %445 = vst.msk [vmem:[%s710_s4 + $0x8] sm:$0xff] %vm443_vm1, %v414_v54 }
 0x165   : > { %v412_v55 = vpop.xlane.xlu0 %411  ;;  %v418_v56 = vpop.xlane.xlu1 %417 }
 0x166   : > { %444 = vst.msk [vmem:[%s710_s4] sm:$0xff] %vm443_vm1, %v412_v55  ;;  %447 = vst.msk [vmem:[%s710_s4 + $0x18] sm:$0xff] %vm443_vm1, %v418_v56 }
 0x169   : > { %v428_v57 = vpop.xlane.xlu0 %427  ;;  %v434_v58 = vpop.xlane.xlu1 %433 }
 0x16a   : > { %452 = vst.msk [vmem:[%s710_s4 + $0x40] sm:$0xff] %vm443_vm1, %v428_v57  ;;  %455 = vst.msk [vmem:[%s710_s4 + $0x58] sm:$0xff] %vm443_vm1, %v434_v58 }
 0x16d   : > { %v432_v59 = vpop.xlane.xlu0 %431  ;;  %v416_v60 = vpop.xlane.xlu1 %415 }
 0x16e   : > { %454 = vst.msk [vmem:[%s710_s4 + $0x50] sm:$0xff] %vm443_vm1, %v432_v59  ;;  %446 = vst.msk [vmem:[%s710_s4 + $0x10] sm:$0xff] %vm443_vm1, %v416_v60 }
 0x171   : > { %v422_v61 = vpop.xlane.xlu1 %421  ;;  %v420_v62 = vpop.xlane.xlu0 %419 }
 0x172   : > { %449 = vst.msk [vmem:[%s710_s4 + $0x28] sm:$0xff] %vm443_vm1, %v422_v61  ;;  %448 = vst.msk [vmem:[%s710_s4 + $0x20] sm:$0xff] %vm443_vm1, %v420_v62 }
 0x175   : > { %v438_v63 = vpop.xlane.xlu1 %437  ;;  %v436_v0 = vpop.xlane.xlu0 %435 }
 0x176   : > { %457 = vst.msk [vmem:[%s710_s4 + $0x68] sm:$0xff] %vm443_vm1, %v438_v63  ;;  %456 = vst.msk [vmem:[%s710_s4 + $0x60] sm:$0xff] %vm443_vm1, %v436_v0 }
 0x179   : > { %v426_v1 = vpop.xlane.xlu1 %425  ;;  %v424_v2 = vpop.xlane.xlu0 %423 }
 0x17a   : > { %451 = vst.msk [vmem:[%s710_s4 + $0x38] sm:$0xff] %vm443_vm1, %v426_v1  ;;  %450 = vst.msk [vmem:[%s710_s4 + $0x30] sm:$0xff] %vm443_vm1, %v424_v2 }
 0x17d   : > { %v442_v3 = vpop.xlane.xlu1 %441  ;;  %v440_v4 = vpop.xlane.xlu0 %439 }
 0x17e   : > { %459 = vst.msk [vmem:[%s710_s4 + $0x78] sm:$0xff] %vm443_vm1, %v442_v3  ;;  %458 = vst.msk [vmem:[%s710_s4 + $0x70] sm:$0xff] %vm443_vm1, %v440_v4 }
 0x17f PF: > { %s13_s12 = sadd.s32 1, %s618_s12  }
 0x180   : > { %p10_p4 = scmp.ge.s32.totalorder %s13_s12, 4  }
 0x182   :  { %12 = sbr.rel (!%p10_p4) target bundleno = 1 (0x1), region = 62 }

</bundles_post_ra>
